<compile_context>
chip_gen: v5e
topology: v5e:2x2
jax: 0.10.0
libtpu: 0.0.40
codegen_flags: <defaults>
</compile_context>

<pallas_src>
import jax
import jax.numpy as jnp
from jax import lax
from jax.experimental import pallas as pl
from jax.experimental.pallas import tpu as pltpu


# dot_general dimension_numbers helpers (no explicit transposes anywhere).
_CONTRACT_DIM0 = (((0,), (0,)), ((), ()))   # contract axis 0 of both operands
_CONTRACT_DIM1 = (((1,), (1,)), ((), ()))   # contract axis 1 of both operands


def _ground_trans_kernel(xl_ref, xh_ref,
                         wth_ref, bth_ref,
                         wph_ref, bph_ref,
                         wg_ref, bg_ref,
                         wz_ref, bz_ref,
                         out_ref,
                         m_scratch):
    """Grid = (batch, s_low_tile).  Channels-first, spatial on lanes.

    xl_ref : (1, C, T_S)       x_low tile
    xh_ref : (1, C, S_high)    full x_high for this batch (resident across tiles)
    w*_ref : (C, Ci) / (Ci, C) projection matrices; b*_ref : (Ci, 1) / (C, 1)
    out_ref: (1, C, T_S)
    m_scratch : (Ci, Ci) persistent VMEM scratch, recomputed at tile == 0.
    """
    t = pl.program_id(1)

    # Once per batch: project x_high -> phi, g (channels-first, S_high on lanes)
    # and reduce to the tiny Ci x Ci matrix m = phi @ g^T.  The 1/S_high 'dot'
    # scaling is already folded into wg/bg by the wrapper.
    @pl.when(t == 0)
    def _():
        xh = xh_ref[0]                                           # (C, S_high)
        phi = lax.dot_general(wph_ref[...], xh, _CONTRACT_DIM0,
                              preferred_element_type=jnp.float32) + bph_ref[...]
        g = lax.dot_general(wg_ref[...], xh, _CONTRACT_DIM0,
                            preferred_element_type=jnp.float32) + bg_ref[...]
        # m[a, b] = sum_s phi[a, s] * g[b, s]
        m_scratch[...] = lax.dot_general(phi, g, _CONTRACT_DIM1,
                                         preferred_element_type=jnp.float32)

    # Per S_low tile: theta projection, aggregation via m, W_z (+ folded BN).
    xl = xl_ref[0]                                               # (C, T_S)
    theta = lax.dot_general(wth_ref[...], xl, _CONTRACT_DIM0,
                            preferred_element_type=jnp.float32) + bth_ref[...]
    # y[b, s] = sum_a m[a, b] * theta[a, s]   -> (Ci, T_S)
    y = lax.dot_general(m_scratch[...], theta, _CONTRACT_DIM0,
                        preferred_element_type=jnp.float32)
    # z[c, s] = sum_b wz[b, c] * y[b, s] + bz[c]   -> (C, T_S)
    z = lax.dot_general(wz_ref[...], y, _CONTRACT_DIM0,
                        preferred_element_type=jnp.float32) + bz_ref[...]
    out_ref[0] = z.astype(out_ref.dtype)


def ground_trans_pallas(x_low, x_high, params, *, tile_s=None):
    """x_low, x_high: NCHW float32.  Returns NCHW float32."""
    n, c, hl, wl = x_low.shape
    _, _, hh, wh = x_high.shape
    s_low = hl * wl
    s_high = hh * wh
    ci = params["w_theta"].shape[1]

    # Channels-first, spatial flattened: pure reshape, no transpose / HBM copy.
    xl = x_low.reshape(n, c, s_low).astype(jnp.float32)
    xh = x_high.reshape(n, c, s_high).astype(jnp.float32)

    # Fold eval-mode BatchNorm into the W_z 1x1 conv.
    eps = 1e-5
    scale = params["bn_gamma"] / jnp.sqrt(params["bn_var"] + eps)      # (C,)
    shift = params["bn_beta"] - params["bn_mean"] * scale              # (C,)
    wz_f = params["w_z"] * scale[None, :]                              # (Ci, C)
    bz_f = params["b_z"] * scale + shift                               # (C,)

    # Fold the 'dot' mode 1/N (= 1/S_high) scaling into the g projection.
    inv_n = 1.0 / float(s_high)
    wg_f = params["w_g"] * inv_n                                       # (C, Ci)
    bg_f = params["b_g"] * inv_n                                       # (Ci,)

    # Pick an S_low tile: multiple of 128 that divides S_low (bounds VMEM,
    # enables pipelining); fall back to the full extent.
    if tile_s is None:
        tile_s = s_low
        for cand in (1024, 512, 256, 128):
            if s_low % cand == 0:
                tile_s = cand
                break
    assert s_low % tile_s == 0
    assert tile_s == s_low or tile_s % 128 == 0
    n_tiles = s_low // tile_s

    weights = [
        params["w_theta"], params["b_theta"].reshape(ci, 1),
        params["w_phi"], params["b_phi"].reshape(ci, 1),
        wg_f, bg_f.reshape(ci, 1),
        wz_f, bz_f.reshape(c, 1),
    ]

    def full_spec(arr):
        nd = arr.ndim
        return pl.BlockSpec(arr.shape, lambda b, t, _nd=nd: (0,) * _nd)

    in_specs = [
        pl.BlockSpec((1, c, tile_s), lambda b, t: (b, 0, t)),    # x_low tile
        pl.BlockSpec((1, c, s_high), lambda b, t: (b, 0, 0)),    # x_high (resident)
    ] + [full_spec(w) for w in weights]

    out_spec = pl.BlockSpec((1, c, tile_s), lambda b, t: (b, 0, t))

    flops = 2 * n * (c * ci * (s_low + 2 * s_high)      # theta/phi/g projections
                     + ci * ci * (s_low + s_high)        # m and y
                     + ci * c * s_low)                   # W_z
    bytes_accessed = 4 * (xl.size + xh.size + n * c * s_low
                          + sum(int(w.size) for w in weights))

    out = pl.pallas_call(
        _ground_trans_kernel,
        out_shape=jax.ShapeDtypeStruct((n, c, s_low), jnp.float32),
        grid_spec=pltpu.PrefetchScalarGridSpec(
            num_scalar_prefetch=0,
            grid=(n, n_tiles),
            in_specs=in_specs,
            out_specs=out_spec,
            scratch_shapes=[pltpu.VMEM((ci, ci), jnp.float32)],
        ),
        compiler_params=pltpu.CompilerParams(
            dimension_semantics=("parallel", "arbitrary"),
            vmem_limit_bytes=48 * 1024 * 1024,
        ),
        cost_estimate=pl.CostEstimate(
            flops=flops, transcendentals=0, bytes_accessed=bytes_accessed),
    )(xl, xh, *weights)

    # (N, C, S_low) -> NCHW: pure reshape.
    return out.reshape(n, c, hl, wl)


def ground_trans_reference(x_low, x_high, params):
    """Pure-JAX reference mirroring the PyTorch forward (mode='dot'),
    including the explicit (S_low, S_high) affinity matrix."""
    n, c, hl, wl = x_low.shape
    _, _, hh, wh = x_high.shape
    s_low, s_high = hl * wl, hh * wh

    xl = x_low.reshape(n, c, s_low).transpose(0, 2, 1)
    xh = x_high.reshape(n, c, s_high).transpose(0, 2, 1)

    theta = xl @ params["w_theta"] + params["b_theta"]
    phi = xh @ params["w_phi"] + params["b_phi"]
    g = xh @ params["w_g"] + params["b_g"]
    f = jnp.einsum("nqc,nkc->nqk", theta, phi)
    f_div = f / s_high
    y = f_div @ g
    z = y @ params["w_z"] + params["b_z"]
    eps = 1e-5
    scale = params["bn_gamma"] / jnp.sqrt(params["bn_var"] + eps)
    shift = params["bn_beta"] - params["bn_mean"] * scale
    z = z * scale + shift
    return z.transpose(0, 2, 1).reshape(n, c, hl, wl)


def make_params(key, in_channels, inter_channels):
    ks = jax.random.split(key, 10)
    c, ci = in_channels, inter_channels
    std = 0.1
    return {
        # 1x1 conv weights stored as (C_in, C_out) matrices
        "w_g": std * jax.random.normal(ks[0], (c, ci), jnp.float32),
        "b_g": std * jax.random.normal(ks[1], (ci,), jnp.float32),
        "w_theta": std * jax.random.normal(ks[2], (c, ci), jnp.float32),
        "b_theta": std * jax.random.normal(ks[3], (ci,), jnp.float32),
        "w_phi": std * jax.random.normal(ks[4], (c, ci), jnp.float32),
        "b_phi": std * jax.random.normal(ks[5], (ci,), jnp.float32),
        "w_z": std * jax.random.normal(ks[6], (ci, c), jnp.float32),
        "b_z": std * jax.random.normal(ks[7], (c,), jnp.float32),
        # BatchNorm2d(in_channels) eval-mode statistics / affine params
        "bn_gamma": 1.0 + 0.1 * jax.random.normal(ks[8], (c,), jnp.float32),
        "bn_beta": 0.1 * jax.random.normal(ks[9], (c,), jnp.float32),
        "bn_mean": jnp.zeros((c,), jnp.float32),
        "bn_var": jnp.ones((c,), jnp.float32),
    }


if __name__ == "__main__":
    key = jax.random.PRNGKey(0)
    k_xl, k_xh, k_p = jax.random.split(key, 3)

    N, C = 2, 4
    INTER_C = C // 2
    H_LOW, W_LOW = 16, 16     # x_low spatial  -> S_low = 256
    H_HIGH, W_HIGH = 8, 8     # x_high spatial -> S_high = 64

    x_low = jax.random.normal(k_xl, (N, C, H_LOW, W_LOW), jnp.float32)
    x_high = jax.random.normal(k_xh, (N, C, H_HIGH, W_HIGH), jnp.float32)
    params = make_params(k_p, C, INTER_C)

    # tile_s=128 -> grid (N, 2): exercises the multi-tile / scratch-reuse path.
    z = ground_trans_pallas(x_low, x_high, params, tile_s=128)
    jax.block_until_ready(z)

    z_ref = ground_trans_reference(x_low, x_high, params)
    assert z.shape == (N, C, H_LOW, W_LOW)
    assert jnp.allclose(z, z_ref, atol=1e-4, rtol=1e-4), "mismatch vs reference"

    print("KERNEL_OK")
</pallas_src>

<mosaic_0001>
module attributes {stable_mosaic.version = 11 : i64} {
  func.func @_ground_trans_kernel(%arg0: i32, %arg1: i32, %arg2: memref<1x4x128xf32, #tpu.memory_space<vmem>>, %arg3: memref<1x4x64xf32, #tpu.memory_space<vmem>>, %arg4: memref<4x2xf32, #tpu.memory_space<vmem>>, %arg5: memref<2x1xf32, #tpu.memory_space<vmem>>, %arg6: memref<4x2xf32, #tpu.memory_space<vmem>>, %arg7: memref<2x1xf32, #tpu.memory_space<vmem>>, %arg8: memref<4x2xf32, #tpu.memory_space<vmem>>, %arg9: memref<2x1xf32, #tpu.memory_space<vmem>>, %arg10: memref<2x4xf32, #tpu.memory_space<vmem>>, %arg11: memref<4x1xf32, #tpu.memory_space<vmem>>, %arg12: memref<1x4x128xf32, #tpu.memory_space<vmem>>, %arg13: memref<2x2xf32, #tpu.memory_space<vmem>>) attributes {dimension_semantics = [#tpu.dimension_semantics<parallel>, #tpu.dimension_semantics<arbitrary>], iteration_bounds = array<i64: 2, 2>, scalar_prefetch = 0 : i64, scratch_operands = 1 : i64, tpu.core_type = #tpu.core_type<tc>, window_params = [{transform_indices = @transform_0, window_bounds = array<i64: 1, 4, 128>}, {transform_indices = @transform_1, window_bounds = array<i64: 1, 4, 64>}, {pipeline_mode = #tpu.pipeline_mode<synchronous>, transform_indices = @transform_2, window_bounds = array<i64: 4, 2>}, {pipeline_mode = #tpu.pipeline_mode<synchronous>, transform_indices = @transform_3, window_bounds = array<i64: 2, 1>}, {pipeline_mode = #tpu.pipeline_mode<synchronous>, transform_indices = @transform_4, window_bounds = array<i64: 4, 2>}, {pipeline_mode = #tpu.pipeline_mode<synchronous>, transform_indices = @transform_5, window_bounds = array<i64: 2, 1>}, {pipeline_mode = #tpu.pipeline_mode<synchronous>, transform_indices = @transform_6, window_bounds = array<i64: 4, 2>}, {pipeline_mode = #tpu.pipeline_mode<synchronous>, transform_indices = @transform_7, window_bounds = array<i64: 2, 1>}, {pipeline_mode = #tpu.pipeline_mode<synchronous>, transform_indices = @transform_8, window_bounds = array<i64: 2, 4>}, {pipeline_mode = #tpu.pipeline_mode<synchronous>, transform_indices = @transform_9, window_bounds = array<i64: 4, 1>}, {transform_indices = @transform_10, window_bounds = array<i64: 1, 4, 128>}]} {
    %c0_i32 = arith.constant 0 : i32
    %0 = arith.cmpi eq, %arg1, %c0_i32 : i32
    %1 = arith.extui %0 : i1 to i32
    %c0_i32_0 = arith.constant 0 : i32
    %2 = arith.cmpi ne, %1, %c0_i32_0 : i32
    scf.if %2 {
      %c0_18 = arith.constant 0 : index
      %c0_19 = arith.constant 0 : index
      %c0_20 = arith.constant 0 : index
      %20 = vector.load %arg3[%c0_18, %c0_19, %c0_20] : memref<1x4x64xf32, #tpu.memory_space<vmem>>, vector<1x4x64xf32>
      %21 = vector.shape_cast %20 : vector<1x4x64xf32> to vector<4x64xf32>
      %c0_21 = arith.constant 0 : index
      %c0_22 = arith.constant 0 : index
      %22 = vector.load %arg6[%c0_21, %c0_22] : memref<4x2xf32, #tpu.memory_space<vmem>>, vector<4x2xf32>
      %cst_23 = arith.constant dense<0.000000e+00> : vector<2x64xf32>
      %23 = tpu.matmul %22, %21, %cst_23 {dimension_numbers = #tpu.dot_dimension_numbers<[0], [0], [1], [1], [0, 1, 1, 1], [], []>} : vector<4x2xf32>, vector<4x64xf32>, vector<2x64xf32> -> vector<2x64xf32>
      %c0_24 = arith.constant 0 : index
      %c0_25 = arith.constant 0 : index
      %24 = vector.load %arg7[%c0_24, %c0_25] : memref<2x1xf32, #tpu.memory_space<vmem>>, vector<2x1xf32>
      %25 = vector.broadcast %24 : vector<2x1xf32> to vector<2x64xf32>
      %26 = arith.addf %23, %25 : vector<2x64xf32>
      %c0_26 = arith.constant 0 : index
      %c0_27 = arith.constant 0 : index
      %27 = vector.load %arg8[%c0_26, %c0_27] : memref<4x2xf32, #tpu.memory_space<vmem>>, vector<4x2xf32>
      %cst_28 = arith.constant dense<0.000000e+00> : vector<2x64xf32>
      %28 = tpu.matmul %27, %21, %cst_28 {dimension_numbers = #tpu.dot_dimension_numbers<[0], [0], [1], [1], [0, 1, 1, 1], [], []>} : vector<4x2xf32>, vector<4x64xf32>, vector<2x64xf32> -> vector<2x64xf32>
      %c0_29 = arith.constant 0 : index
      %c0_30 = arith.constant 0 : index
      %29 = vector.load %arg9[%c0_29, %c0_30] : memref<2x1xf32, #tpu.memory_space<vmem>>, vector<2x1xf32>
      %30 = vector.broadcast %29 : vector<2x1xf32> to vector<2x64xf32>
      %31 = arith.addf %28, %30 : vector<2x64xf32>
      %cst_31 = arith.constant dense<0.000000e+00> : vector<2x2xf32>
      %32 = tpu.matmul %26, %31, %cst_31 {dimension_numbers = #tpu.dot_dimension_numbers<[1], [1], [0], [0], [0, 0, 1, 0], [], []>} : vector<2x64xf32>, vector<2x64xf32>, vector<2x2xf32> -> vector<2x2xf32>
      %c0_32 = arith.constant 0 : index
      %c0_33 = arith.constant 0 : index
      %33 = vector.load %arg13[%c0_32, %c0_33] : memref<2x2xf32, #tpu.memory_space<vmem>>, vector<2x2xf32>
      tpu.vector_store %arg13[%c0_32, %c0_33], %32 {strides = array<i32>} : memref<2x2xf32, #tpu.memory_space<vmem>>, vector<2x2xf32>,
    } else {
    }
    %c0 = arith.constant 0 : index
    %c0_1 = arith.constant 0 : index
    %c0_2 = arith.constant 0 : index
    %3 = vector.load %arg2[%c0, %c0_1, %c0_2] : memref<1x4x128xf32, #tpu.memory_space<vmem>>, vector<1x4x128xf32>
    %4 = vector.shape_cast %3 : vector<1x4x128xf32> to vector<4x128xf32>
    %c0_3 = arith.constant 0 : index
    %c0_4 = arith.constant 0 : index
    %5 = vector.load %arg4[%c0_3, %c0_4] : memref<4x2xf32, #tpu.memory_space<vmem>>, vector<4x2xf32>
    %cst = arith.constant dense<0.000000e+00> : vector<2x128xf32>
    %6 = tpu.matmul %5, %4, %cst {dimension_numbers = #tpu.dot_dimension_numbers<[0], [0], [1], [1], [0, 1, 1, 1], [], []>} : vector<4x2xf32>, vector<4x128xf32>, vector<2x128xf32> -> vector<2x128xf32>
    %c0_5 = arith.constant 0 : index
    %c0_6 = arith.constant 0 : index
    %7 = vector.load %arg5[%c0_5, %c0_6] : memref<2x1xf32, #tpu.memory_space<vmem>>, vector<2x1xf32>
    %8 = vector.broadcast %7 : vector<2x1xf32> to vector<2x128xf32>
    %9 = arith.addf %6, %8 : vector<2x128xf32>
    %c0_7 = arith.constant 0 : index
    %c0_8 = arith.constant 0 : index
    %10 = vector.load %arg13[%c0_7, %c0_8] : memref<2x2xf32, #tpu.memory_space<vmem>>, vector<2x2xf32>
    %cst_9 = arith.constant dense<0.000000e+00> : vector<2x128xf32>
    %11 = tpu.matmul %10, %9, %cst_9 {dimension_numbers = #tpu.dot_dimension_numbers<[0], [0], [1], [1], [0, 1, 1, 1], [], []>} : vector<2x2xf32>, vector<2x128xf32>, vector<2x128xf32> -> vector<2x128xf32>
    %c0_10 = arith.constant 0 : index
    %c0_11 = arith.constant 0 : index
    %12 = vector.load %arg10[%c0_10, %c0_11] : memref<2x4xf32, #tpu.memory_space<vmem>>, vector<2x4xf32>
    %cst_12 = arith.constant dense<0.000000e+00> : vector<4x128xf32>
    %13 = tpu.matmul %12, %11, %cst_12 {dimension_numbers = #tpu.dot_dimension_numbers<[0], [0], [1], [1], [0, 1, 1, 1], [], []>} : vector<2x4xf32>, vector<2x128xf32>, vector<4x128xf32> -> vector<4x128xf32>
    %c0_13 = arith.constant 0 : index
    %c0_14 = arith.constant 0 : index
    %14 = vector.load %arg11[%c0_13, %c0_14] : memref<4x1xf32, #tpu.memory_space<vmem>>, vector<4x1xf32>
    %15 = vector.broadcast %14 : vector<4x1xf32> to vector<4x128xf32>
    %16 = arith.addf %13, %15 : vector<4x128xf32>
    %c0_15 = arith.constant 0 : index
    %c0_16 = arith.constant 0 : index
    %c0_17 = arith.constant 0 : index
    %17 = vector.load %arg12[%c0_15, %c0_16, %c0_17] : memref<1x4x128xf32, #tpu.memory_space<vmem>>, vector<1x4x128xf32>
    %18 = vector.shape_cast %17 : vector<1x4x128xf32> to vector<4x128xf32>
    %19 = vector.shape_cast %16 : vector<4x128xf32> to vector<1x4x128xf32>
    tpu.vector_store %arg12[%c0_15, %c0_16, %c0_17], %19 {strides = array<i32>} : memref<1x4x128xf32, #tpu.memory_space<vmem>>, vector<1x4x128xf32>,
    return
  }
  func.func @transform_0(%arg0: i32, %arg1: i32) -> (i32, i32, i32) {
    %c0_i32 = arith.constant 0 : i32
    %c0_i32_0 = arith.constant 0 : i32
    return %arg0, %c0_i32, %arg1 : i32, i32, i32
  }
  func.func @transform_1(%arg0: i32, %arg1: i32) -> (i32, i32, i32) {
    %c0_i32 = arith.constant 0 : i32
    %c0_i32_0 = arith.constant 0 : i32
    %c0_i32_1 = arith.constant 0 : i32
    return %arg0, %c0_i32, %c0_i32_0 : i32, i32, i32
  }
  func.func @transform_2(%arg0: i32, %arg1: i32) -> (i32, i32) {
    %c0_i32 = arith.constant 0 : i32
    %c0_i32_0 = arith.constant 0 : i32
    %c0_i32_1 = arith.constant 0 : i32
    return %c0_i32, %c0_i32_0 : i32, i32
  }
  func.func @transform_3(%arg0: i32, %arg1: i32) -> (i32, i32) {
    %c0_i32 = arith.constant 0 : i32
    %c0_i32_0 = arith.constant 0 : i32
    %c0_i32_1 = arith.constant 0 : i32
    return %c0_i32, %c0_i32_0 : i32, i32
  }
  func.func @transform_4(%arg0: i32, %arg1: i32) -> (i32, i32) {
    %c0_i32 = arith.constant 0 : i32
    %c0_i32_0 = arith.constant 0 : i32
    %c0_i32_1 = arith.constant 0 : i32
    return %c0_i32, %c0_i32_0 : i32, i32
  }
  func.func @transform_5(%arg0: i32, %arg1: i32) -> (i32, i32) {
    %c0_i32 = arith.constant 0 : i32
    %c0_i32_0 = arith.constant 0 : i32
    %c0_i32_1 = arith.constant 0 : i32
    return %c0_i32, %c0_i32_0 : i32, i32
  }
  func.func @transform_6(%arg0: i32, %arg1: i32) -> (i32, i32) {
    %c0_i32 = arith.constant 0 : i32
    %c0_i32_0 = arith.constant 0 : i32
    %c0_i32_1 = arith.constant 0 : i32
    return %c0_i32, %c0_i32_0 : i32, i32
  }
  func.func @transform_7(%arg0: i32, %arg1: i32) -> (i32, i32) {
    %c0_i32 = arith.constant 0 : i32
    %c0_i32_0 = arith.constant 0 : i32
    %c0_i32_1 = arith.constant 0 : i32
    return %c0_i32, %c0_i32_0 : i32, i32
  }
  func.func @transform_8(%arg0: i32, %arg1: i32) -> (i32, i32) {
    %c0_i32 = arith.constant 0 : i32
    %c0_i32_0 = arith.constant 0 : i32
    %c0_i32_1 = arith.constant 0 : i32
    return %c0_i32, %c0_i32_0 : i32, i32
  }
  func.func @transform_9(%arg0: i32, %arg1: i32) -> (i32, i32) {
    %c0_i32 = arith.constant 0 : i32
    %c0_i32_0 = arith.constant 0 : i32
    %c0_i32_1 = arith.constant 0 : i32
    return %c0_i32, %c0_i32_0 : i32, i32
  }
  func.func @transform_10(%arg0: i32, %arg1: i32) -> (i32, i32, i32) {
    %c0_i32 = arith.constant 0 : i32
    %c0_i32_0 = arith.constant 0 : i32
    return %arg0, %c0_i32, %arg1 : i32, i32, i32
  }
}

</mosaic_0001>

<bundles_post_ra>
// kernel: tpu_custom_call.1
= control target key start
LH: loop header
LB: loop body
LE: loop exit
PB: predicated region body
PF: predicated region fallthrough
CT: control target
= control target key end

     0   :  { %15 = vsyncpa [#allocation4], 0  ;;  %s1289_s0 = inlined_call_operand.vmem [shape: f32[2,4,256], index: 0, kind: input, shape index: {}]   ;;  %s1290_s1 = inlined_call_operand.vmem [shape: f32[2,4,64], index: 1, kind: input, shape index: {}]   ;;  %s1291_s2 = inlined_call_operand.vmem [shape: f32[4,2], index: 2, kind: input, shape index: {}]   ;;  %s1292_s3 = inlined_call_operand.vmem [shape: f32[2,1], index: 3, kind: input, shape index: {}]   ;;  %s1293_s4 = inlined_call_operand.vmem [shape: f32[4,2], index: 4, kind: input, shape index: {}]   ;;  %s1294_s5 = inlined_call_operand.vmem [shape: f32[2,1], index: 5, kind: input, shape index: {}]   ;;  %s1295_s6 = inlined_call_operand.vmem [shape: f32[4,2], index: 6, kind: input, shape index: {}]   ;;  %s1296_s7 = inlined_call_operand.vmem [shape: f32[2,1], index: 7, kind: input, shape index: {}]   ;;  %s1297_s8 = inlined_call_operand.vmem [shape: f32[2,4], index: 8, kind: input, shape index: {}]   ;;  %s1298_s9 = inlined_call_operand.vmem [shape: f32[4,1], index: 9, kind: input, shape index: {}]   ;;  %s1299_s10 = inlined_call_operand.hbm [shape: f32[2,4,256], index: 10, kind: output, shape index: {}]  }
   0x1   :  { %17 = vsyncpa [#allocation4 + $0x1], 0  ;;  %s1125_s13 = smov 0   ;;  %s1127_s14 = smov 0  }
   0x2   :  { %s1129_s15 = smov 0   ;;  %s1131_s16 = smov 0  }
   0x3   :  { %s1133_s17 = smov 0   ;;  %s1135_s18 = smov 0  }
   0x4   :  { %s1137_s19 = smov 0   ;;  %s1139_s20 = smov 0  }
   0x5 LB: > { %1310 = sst [smem:[#allocation6_spill]] %s1038_s13  ;;  %s866_s21 = sadd.s32 4294967295, %s1066_s20   ;;  %s1066_s20 = sphi %s1139_s20, %s23_s20   ;;  %s1062_s19 = sphi %s1137_s19, %s1330_s19   ;;  %s1058_s18 = sphi %s1135_s18, %s1329_s18   ;;  %s1054_s17 = sphi %s1133_s17, %s1328_s17   ;;  %s1050_s16 = sphi %s1131_s16, %s1327_s16   ;;  %s1046_s15 = sphi %s1129_s15, %s1326_s15   ;;  %s1042_s14 = sphi %s1127_s14, %s1332_s14   ;;  %s1038_s13 = sphi %s1125_s13, %s1331_s13  }
   0x6   : > { %1311 = sst [smem:[#allocation7_spill]] %s1046_s15  ;;  %s867_s22 = sadd.s32 4294967294, %s1066_s20  }
   0x7   : > { %1312 = sst [smem:[#allocation8_spill]] %s1058_s18  ;;  %s32_s23 = sadd.s32 1, %s1058_s18 }
   0x8   : > { %1313 = sst [smem:[#allocation9_spill]] %s1062_s19  ;;  %p33_p0 = scmp.ge.s32.totalorder %s32_s23, 2 }
   0x9   : > { %1314 = sst [smem:[#allocation10_spill]] %s1066_s20  ;;  %s35_s24 = sadd.s32 1, %s1062_s19 }
   0xa   : > { %p276_p1 = scmp.ne.s32.totalorder %s1046_s15, %s1042_s14  ;;  %p277_p2 = scmp.eq.s32.totalorder %s866_s21, 3 }
   0xb   : > { %s1334_s23 = smov (%p33_p0, %s32_s23), 0  ;;  %s1336_s24 = smov (!%p33_p0, %s35_s24), %s1062_s19 }
   0xc   : > { %1315 = sst [smem:[#allocation11_spill]] %s1334_s23  ;;  %s262_s25 = ssub.s32 %s1058_s18, %s1334_s23 }
   0xd   : > { %p1176_p3 = por %p277_p2, %p276_p1  ;;  %p37_p4 = scmp.ge.s32.totalorder %s1336_s24, 2 }
   0xe   : > { %p282_p5 = scmp.ne.s32.totalorder %s1042_s14, %s1038_s13  ;;  %p283_p6 = scmp.eq.s32.totalorder %s867_s22, 3 }
   0xf   : > { %p870_p7 = scmp.ge.s32.totalorder %s1066_s20, 1  ;;  %s1338_s24 = smov (%p37_p4, %s1336_s24), 0 }
  0x10   : > { %1317 = sst [smem:[#allocation12_spill]] %s1338_s24  ;;  %p1185_p8 = por %p283_p6, %p282_p5 }
  0x11   : > { %p343_p9 = scmp.lt.s32.totalorder %s1066_s20, 5  ;;  %s261_s28 = ssub.s32 %s1062_s19, %s1338_s24 }
  0x12   : > { %s1318_s27 = scalar_select %p1185_p8, 1, 0 }
  0x13   : > { %s266_s29 = sadd.s32 1, %s1046_s15  ;;  %s263_s30 = sor.u32 %s262_s25, %s261_s28 }
  0x14   : > { %1319 = sst [smem:[#allocation13_spill]] %s1318_s27  ;;  %p344_p10 = pnand %p870_p7, %p343_p9 }
  0x15   : > { %p264_p11 = scmp.eq.s32.totalorder %s263_s30, 0  ;;  %s1307_s12 = sand.u32 (!%p344_p10), 1, %s1042_s14  }
  0x16   : > { %347 = sbr.rel (%p344_p10) target bundleno = 1030 (0x406), region = 60  ;;  %p388_p12 = scmp.lt.s32.totalorder (!%p344_p10), %s1054_s17, 1 }
  0x17   : > { %s1194_s11 = scalar_select %p264_p11, %s1046_s15, %s266_s29  }
  0x18   : > { %s1200_s21 = sshll.u32 (!%p344_p10), %s1307_s12, 2  ;;  %p390_p13 = scmp.lt.s32.totalorder (!%p344_p10), %s1050_s16, 1 }
  0x19   : > { %1320 = sst [smem:[#allocation14_spill]] %s1194_s11  ;;  %s387_s13 = scalar_lea.vmem (!%p344_p10), [#allocation3], %s1200_s21 }
  0x1a   : > { %p875_p0 = scmp.ne.s32.totalorder (!%p344_p10), %s1050_s16, 0 }
  0x1b   : > { %s389_s22 = scalar_select %p388_p12, %s1054_s17, 1 }
  0x1c   : > { %s391_s25 = scalar_select %p390_p13, %s1050_s16, 1 }
  0x1d   : > { %s872_s28 = sshll.u32 %s389_s22, 1  ;;  %s874_s30 = sshll.u32 %s389_s22, 2 }
  0x1e   : > { %s393_s29 = sadd.s32 %s872_s28, %s391_s25  ;;  %s399_s19 = scalar_lea.vmem %s1290_s1, %s874_s30 }
  0x1f   : > { %s873_s18 = sshll.u32 %s393_s29, 2  ;;  %403 = sbr.rel (%p875_p0) target bundleno = 471 (0x1d7), region = 64 }
  0x20   : > { %s1211_s27 = scalar_lea.vmem %s1289_s0, %s873_s18 }
  0x24   : > { %v472_v0 = vld [vmem:[%s1295_s6] sm:$0xf]  ;;  %vm448_vm0 = vcmask 1043456   ;;  %v1068_v4 = vmov 0   ;;  %vm444_vm1 = vcmask 31744   ;;  %vm534_vm2 = vcmask 523264  }
  0x25   : > { %479 = vxpose.xlu0.b32.start.end [1/1] (short) (narrow) %v472_v0, 8  ;;  %v405_v1 = vld [vmem:[%s1293_s4] sm:$0xf]  ;;  %968 = vset.pattern.permute.xlu1 %v1068_v4  ;;  %vm561_vm3 = vcmask 9216  }
  0x26   : > { %v404_v2 = vld [vmem:[%s399_s19] sm:$0xf] }
  0x27   : > { %878 = vmatpush.msk.msra.mxu1 %vm448_vm0, %v404_v2  ;;  %876 = vmatpush.msk.msra.mxu0 %vm448_vm0, %v404_v2  ;;  %v473_v3 = vld [vmem:[%s1296_s7] sm:$0x3] }
  0x28   : > { %476 = vperm.xlu1 %968, %v473_v3   ;;  %v406_v5 = vld [vmem:[%s1294_s5] sm:$0x3] }
  0x2d   : > { %412 = vxpose.xlu0.b32.start.end [1/1] (short) (narrow) %v405_v1, 8 }
  0x30   : > { %409 = vperm.xlu1 %968, %v406_v5  }
  0x94   : > { %969 = vset.pattern.permute.xlu0 %v1068_v4 }
  0x9a   : > { %v477_v8 = vpop.permute.xlu1 %476 }
  0xa2   : > { %v410_v11 = vpop.permute.xlu1 %409 }
  0xc9   : > { %v495_v6 = vpop.trf.xlu0 }
  0xca   : > { %879 = vmatmul.msk.f32.vlgmr.msra.gmra.mxu1 %vm444_vm1, %v495_v6 }
  0xd1   : > { %v428_v7 = vpop.trf.xlu0 }
  0xd2   : > { %877 = vmatmul.msk.f32.vlgmr.msra.gmra.mxu0 %vm444_vm1, %v428_v7 }
 0x147   : > { %v531_v9 = vpop.f32.mrf.mxu1 }
 0x148   : > { %v532_v10 = vadd.f32 %v531_v9, %v477_v8 }
 0x14a   : > { %880 = vmatpush.xpose.msk.msra.mxu2 %vm534_vm2, %v532_v10 }
 0x14f   : > { %v469_v12 = vpop.f32.mrf.mxu0 }
 0x150   : > { %v470_v13 = vadd.f32 %v469_v12, %v410_v11 }
 0x152   : > { %881 = vmatmul.msk.f32.vlgmr.msra.gmra.mxu2 %vm534_vm2, %v470_v13 }
 0x1d5   : > { %v558_v14 = vpop.f32.mrf.mxu2 }
 0x1d6   : > { %562 = vst.msk [vmem:[#allocation2] sm:$0x3] %vm561_vm3, %v558_v14 }
 0x1d7 PF: > { %v564_v15 = vld [vmem:[%s1291_s2] sm:$0xf]  ;;  %vm607_vm4 = vcmask 1043456   ;;  %v1069_v20 = vmov 0   ;;  %vm603_vm5 = vcmask 31744   ;;  %vm668_vm6 = vcmask 1041408  }
 0x1d8   : > { %571 = vxpose.xlu0.b32.start.end [1/1] (short) (narrow) %v564_v15, 8  ;;  %v563_v17 = vld [vmem:[%s1211_s27] sm:$0xf]  ;;  %971 = vset.pattern.permute.xlu2 %v1069_v20  ;;  %vm664_vm7 = vcmask 15360   ;;  %s889_s22 = sshll.u32 %s1054_s17, 1  ;;  %s773_s19 = sshll.u32 %s387_s13, 4  ;;  %s774_s19 = int_to_ptr.vmem [resolvable:$true] %s773_s19 }
 0x1d9   : > { %882 = vmatpush.msk.msra.mxu0 %vm607_vm4, %v563_v17  ;;  %v565_v18 = vld [vmem:[%s1292_s3] sm:$0x3]  ;;  %s769_s25 = sadd.s32 %s1050_s16, %s889_s22  ;;  %s1321_s11 = sand.u32 1, %s1042_s14  }
 0x1da   : > { %v692_v19 = vld [vmem:[%s1297_s8] sm:$0x3]  ;;  %s890_s15 = sshll.u32 %s769_s25, 2  ;;  %s759_s12 = scalar_lea.sflag [#allocation4], %s1321_s11 }
 0x1db   : > { %v693_v26 = vld [vmem:[%s1298_s9] sm:$0xf]  ;;  %s771_s23 = scalar_lea.hbm %s1299_s10, %s890_s15  ;;  %s992_s27 = scalar_lea.hbm %s1299_s10, 16 }
 0x1dc   : > { %696 = vperm.xlu2 %971, %v693_v26   ;;  %s775_s24 = sshll.u32 %s771_s23, 4  ;;  %s776_s24 = int_to_ptr.hbm [resolvable:$true] %s775_s24 }
 0x1dd   : > { %v631_v16 = vld [vmem:[#allocation2] sm:$0x3]  ;;  %s986_s17 = sshra.s32 %s776_s24, 4  ;;  %s987_s17 = int_to_ptr.hbm [resolvable:$true] %s986_s17 }
 0x1de   : > { %632 = vxpose.xlu1.b32.start.end [1/1] (short) (narrow) %v631_v16, 8  ;;  %s988_s16 = scalar_lea.hbm %s987_s17, 4  ;;  %p993_p5 = scmp.lt.s32.totalorder %s987_s17, %s1299_s10 }
 0x1df   : > { %p989_p1 = scmp.ne.s32.totalorder %s987_s17, %s988_s16  ;;  %p994_p6 = scmp.lt.s32.totalorder %s992_s27, %s988_s16 }
 0x1e1   : > { %p990_p2 = pnand %p989_p1, %p1176_p3  ;;  %p995_p7 = por %p994_p6, %p993_p5 }
 0x1e3   : > { %p991_p4 = pneg %p990_p2 }
 0x1e5   : > { %p996_p9 = pnand %p995_p7, %p991_p4 }
 0x1e6   : > { %699 = vxpose.xlu1.b32.start.end [1/1] (short) (narrow) %v692_v19, 8 }
 0x236   : > { %v697_v29 = vpop.permute.xlu2 %696 }
 0x23f   : > { %970 = vset.pattern.permute.xlu0 %v1069_v20 }
 0x246   : > { %568 = vperm.xlu0 %970, %v565_v18  }
 0x27c   : > { %v587_v21 = vpop.trf.xlu0 }
 0x27d   : > { %883 = vmatmul.msk.f32.vlgmr.msra.gmra.mxu0 %vm603_vm5, %v587_v21 }
 0x282   : > { %v648_v25 = vpop.trf.xlu1 }
 0x28a   : > { %v715_v27 = vpop.trf.xlu1 }
 0x2b8   : > { %v569_v22 = vpop.permute.xlu0 %568 }
 0x2fa   : > { %v628_v23 = vpop.f32.mrf.mxu0 }
 0x2fb   : > { %v629_v24 = vadd.f32 %v628_v23, %v569_v22 }
 0x2fd   : > { %884 = vmatpush.msk.msra.mxu1 %vm668_vm6, %v629_v24 }
 0x2fe   : > { %885 = vmatmul.msk.f32.vlgmr.msra.gmra.mxu1 %vm664_vm7, %v648_v25 }
 0x37b   : > { %v689_v28 = vpop.f32.mrf.mxu1 }
 0x37c   : > { %886 = vmatpush.msk.msra.mxu2 %vm668_vm6, %v689_v28 }
 0x37d   : > { %887 = vmatmul.msk.f32.vlgmr.msra.gmra.mxu2 %vm664_vm7, %v715_v27 }
 0x400   : > { %v754_v30 = vpop.f32.mrf.mxu2 }
 0x401   : > { %v755_v31 = vadd.f32 %v754_v30, %v697_v29 }
 0x403   : > { %757 = vst [vmem:[%s387_s13] sm:$0xf] %v755_v31 }
 0x404   : > { %999 = shalt.err (!%p996_p9)
}
 0x405   : > { %893 = dma.vmem_to_hbm [thread:$0]  (%p1176_p3), %s774_s19, 64, %s776_s24, %s759_s12  }
 0x406 PF: > { %s1322_s13 = sld [smem:[#allocation10_spill]] }
 0x407   : > { %s1323_s21 = sld [smem:[#allocation6_spill]] }
 0x40c   : > { %p899_p10 = scmp.ge.s32.totalorder %s1322_s13, 2 }
 0x40d   : > { %s787_s15 = sand.u32 1, %s1323_s21  }
 0x40e   : > { %p896_p11 = pnand %p899_p10, %p1185_p8  ;;  %s788_s18 = scalar_lea.sflag [#allocation4], %s787_s15 }
 0x410   : > { %p897_p12 = pneg %p896_p11 }
 0x412   : > { %1033 = dma.done.wait (%p897_p12), %s788_s18, 64  }
 0x413   : > { %1035 = vsyncadd (%p897_p12), %s788_s18, 4294967232  ;;  %s23_s20 = sadd.s32 1, %s1322_s13   ;;  %s1325_s23 = sld [smem:[#allocation7_spill]] }
 0x414   : > { %p20_p13 = scmp.ge.s32.totalorder %s23_s20, 6   ;;  %s1326_s15 = sld [smem:[#allocation14_spill]] }
 0x415   : > { %s1327_s16 = sld [smem:[#allocation8_spill]]  ;;  %s1331_s13 = smov %s1042_s14 }
 0x416   : > { %s1328_s17 = sld [smem:[#allocation9_spill]]  ;;  %22 = sbr.rel (!%p20_p13) target bundleno = 5 (0x5), region = 102 }
 0x417   : > { %s1329_s18 = sld [smem:[#allocation11_spill]] }
 0x418   : > { %s1330_s19 = sld [smem:[#allocation12_spill]] }
 0x419   : > { %s1332_s14 = smov %s1325_s23 }
 0x41b   :  { %794 = vsyncpa [#allocation4], 1 }
 0x41c   :  { %796 = vsyncpa [#allocation4 + $0x1], 1 }

</bundles_post_ra>
